<compile_context>
chip_gen: v7x
topology: tpu7x:2x2x1
jax: 0.10.0
libtpu: 0.0.40
codegen_flags: <defaults>
</compile_context>

<pallas_src>
import jax
import jax.numpy as jnp
from jax.experimental import pallas as pl
from jax.experimental.pallas import tpu as pltpu

_EPS = 1e-5


def _round_up(x, m):
    return (x + m - 1) // m * m


# ---------------------------------------------------------------------------
# Fused kernel: per batch tile   h = x @ W1 ; BN as one FMA ; ReLU ; @ W2 + b2
# ---------------------------------------------------------------------------
def _fused_kernel(x_ref, w1_ref, scale_ref, shift_ref, w2_ref, b2_ref, o_ref):
    # b1 intentionally absent: cancelled exactly by the BN mean subtraction.
    h = jnp.dot(x_ref[...], w1_ref[...],
                preferred_element_type=scale_ref.dtype)
    a = jnp.maximum(h * scale_ref[...] + shift_ref[...], 0.0)
    out = jnp.dot(a.astype(w2_ref.dtype), w2_ref[...],
                  preferred_element_type=jnp.float32)
    o_ref[...] = (out + b2_ref[...]).astype(o_ref.dtype)


def _vmem_bytes(tn, in_dim, h_pad, o_pad, cbytes, ebytes):
    """Rough VMEM working-set estimate for one grid step (double-buffered)."""
    resident = (in_dim * h_pad + h_pad * o_pad) * cbytes       # W1, W2
    resident += 2 * h_pad * ebytes + o_pad * 4                 # scale, shift, b2
    tiles = 2 * tn * in_dim * cbytes                           # x tile (x2 bufs)
    tiles += 2 * tn * o_pad * 4                                # out tile (x2 bufs)
    tiles += tn * h_pad * (ebytes + cbytes)                    # live h / a values
    return resident + tiles


def fcl_1_bn_forward(x, params, *, block_n=512,
                     compute_dtype=jnp.float32,
                     elementwise_dtype=jnp.float32):
    """x: [N, in_dim] float32.  params: dict from init_params.

    compute_dtype: matmul operand dtype (bf16 is fine on v5e/v6e/v7x; the MXU
      runs bf16 at full rate and it halves x/W DMA bytes).  BN statistics are
      always computed in f32.
    elementwise_dtype: dtype of the BN FMA + ReLU.  Keep f32 on v5e (no bf16
      VALU); bf16 on v6e/v7x removes two per-element casts.
    """
    w1, gamma, beta, w2, b2 = (params["w1"], params["gamma"], params["beta"],
                               params["w2"], params["b2"])
    # NOTE: params["b1"] is intentionally unused by the kernel (see header).

    n, in_dim = x.shape
    hidden = w1.shape[1]
    out_dim = w2.shape[1]

    h_pad = _round_up(hidden, 128)
    o_pad = _round_up(out_dim, 128)

    cbytes = jnp.dtype(compute_dtype).itemsize
    ebytes = jnp.dtype(elementwise_dtype).itemsize

    # Largest batch tile (multiple of 8, <= block_n) that fits a 48 MiB
    # working set -> v7x-safe, and large enough to hit the HBM roofline.
    budget = 48 * 1024 * 1024
    tn = _round_up(min(block_n, _round_up(n, 8)), 8)
    while tn > 8 and _vmem_bytes(tn, in_dim, h_pad, o_pad, cbytes, ebytes) > budget:
        tn = _round_up(tn // 2, 8)
    n_pad = _round_up(n, tn)
    n_tiles = n_pad // tn

    # ---- BN statistics, analytically, in f32 (tiny XLA ops) ----------------
    # sum_n h[n,j]   = (sum_n x[n,:]) @ W1[:,j]
    # sum_n h[n,j]^2 = W1[:,j]^T (x^T x) W1[:,j]
    x32 = x.astype(jnp.float32)
    w1_32 = w1.astype(jnp.float32)
    col_sum = jnp.sum(x32, axis=0, keepdims=True) @ w1_32           # [1, H]
    gram = x32.T @ x32                                              # [in, in]
    col_ssq = jnp.sum(w1_32 * (gram @ w1_32), axis=0, keepdims=True)  # [1, H]
    inv_n = jnp.float32(1.0 / n)
    mean = col_sum * inv_n
    var = jnp.maximum(col_ssq * inv_n - mean * mean, 0.0)
    scale = gamma.astype(jnp.float32) * jax.lax.rsqrt(var + _EPS)
    shift = beta.astype(jnp.float32) - mean * scale

    # ---- lane-dense / batch padding (zero padding is exact: padded hidden
    # channels get scale = shift = 0 and zero W2 rows; padded batch rows are
    # sliced off at the end; stats above use the real n) ---------------------
    xp = x if n_pad == n else jnp.pad(x, ((0, n_pad - n), (0, 0)))
    xp = xp.astype(compute_dtype)
    w1p = jnp.pad(w1, ((0, 0), (0, h_pad - hidden))).astype(compute_dtype)
    w2p = jnp.pad(w2, ((0, h_pad - hidden), (0, o_pad - out_dim))).astype(compute_dtype)
    b2p = jnp.pad(b2, ((0, 0), (0, o_pad - out_dim))).astype(jnp.float32)
    scalep = jnp.pad(scale, ((0, 0), (0, h_pad - hidden))).astype(elementwise_dtype)
    shiftp = jnp.pad(shift, ((0, 0), (0, h_pad - hidden))).astype(elementwise_dtype)

    # ---- single fused pallas_call over a fully parallel batch-tile grid ----
    out = pl.pallas_call(
        _fused_kernel,
        grid=(n_tiles,),
        in_specs=[
            pl.BlockSpec((tn, in_dim), lambda i: (i, 0)),      # x tile
            pl.BlockSpec((in_dim, h_pad), lambda i: (0, 0)),   # W1 (resident)
            pl.BlockSpec((1, h_pad), lambda i: (0, 0)),        # scale (resident)
            pl.BlockSpec((1, h_pad), lambda i: (0, 0)),        # shift (resident)
            pl.BlockSpec((h_pad, o_pad), lambda i: (0, 0)),    # W2 (resident)
            pl.BlockSpec((1, o_pad), lambda i: (0, 0)),        # b2 (resident)
        ],
        out_specs=pl.BlockSpec((tn, o_pad), lambda i: (i, 0)),
        out_shape=jax.ShapeDtypeStruct((n_pad, o_pad), jnp.float32),
        compiler_params=pltpu.CompilerParams(
            dimension_semantics=("parallel",),                 # megacore on v7x
            vmem_limit_bytes=64 * 1024 * 1024),
    )(xp, w1p, scalep, shiftp, w2p, b2p)

    return out[:n, :out_dim]


def init_params(key, in_dim, n_hidden_1, out_dim):
    """PyTorch-style (uniform +-1/sqrt(fan_in)) init.  Linear weights stored
    pre-transposed: w1 [in_dim, H], w2 [H, out_dim]; vectors kept 2-D."""
    k1, k2, k3, k4, k5, k6 = jax.random.split(key, 6)
    lim1 = 1.0 / jnp.sqrt(in_dim)
    lim2 = 1.0 / jnp.sqrt(n_hidden_1)
    return {
        "w1": jax.random.uniform(k1, (in_dim, n_hidden_1), jnp.float32, -lim1, lim1),
        "b1": jax.random.uniform(k2, (1, n_hidden_1), jnp.float32, -lim1, lim1),
        "gamma": 1.0 + 0.1 * jax.random.normal(k3, (1, n_hidden_1), jnp.float32),
        "beta": 0.1 * jax.random.normal(k4, (1, n_hidden_1), jnp.float32),
        "w2": jax.random.uniform(k5, (n_hidden_1, out_dim), jnp.float32, -lim2, lim2),
        "b2": jax.random.uniform(k6, (1, out_dim), jnp.float32, -lim2, lim2),
    }


def _reference_forward(x, params):
    """Pure-JAX reference matching PyTorch training-mode forward (with b1)."""
    h = x @ params["w1"] + params["b1"]
    mean = jnp.mean(h, axis=0, keepdims=True)
    var = jnp.mean((h - mean) ** 2, axis=0, keepdims=True)
    h = (h - mean) / jnp.sqrt(var + _EPS) * params["gamma"] + params["beta"]
    h = jnp.maximum(h, 0.0)
    return h @ params["w2"] + params["b2"]


if __name__ == "__main__":
    # batch=256, in=32, hidden=64, out=16 (batch tile 256 -> single grid step)
    N, IN_DIM, HIDDEN, OUT_DIM = 256, 32, 64, 16

    key = jax.random.PRNGKey(0)
    kx, kp = jax.random.split(key)
    x = jax.random.normal(kx, (N, IN_DIM), jnp.float32)
    params = init_params(kp, IN_DIM, HIDDEN, OUT_DIM)

    out = jax.block_until_ready(fcl_1_bn_forward(x, params))
    ref = _reference_forward(x, params)

    assert out.shape == (N, OUT_DIM)
    assert jnp.allclose(out, ref, atol=1e-4, rtol=1e-4), (
        "mismatch vs reference, max abs err = "
        f"{float(jnp.max(jnp.abs(out - ref)))}")

    print("KERNEL_OK")
</pallas_src>

<mosaic_0001>
module attributes {stable_mosaic.version = 11 : i64} {
  func.func @_fused_kernel(%arg0: i32, %arg1: memref<256x32xf32, #tpu.memory_space<vmem>>, %arg2: memref<32x128xf32, #tpu.memory_space<vmem>>, %arg3: memref<1x128xf32, #tpu.memory_space<vmem>>, %arg4: memref<1x128xf32, #tpu.memory_space<vmem>>, %arg5: memref<128x128xf32, #tpu.memory_space<vmem>>, %arg6: memref<1x128xf32, #tpu.memory_space<vmem>>, %arg7: memref<256x128xf32, #tpu.memory_space<vmem>>) attributes {dimension_semantics = [#tpu.dimension_semantics<parallel>], iteration_bounds = array<i64: 1>, scalar_prefetch = 0 : i64, scratch_operands = 0 : i64, tpu.core_type = #tpu.core_type<tc>, window_params = [{transform_indices = @transform_0, window_bounds = array<i64: 256, 32>}, {pipeline_mode = #tpu.pipeline_mode<synchronous>, transform_indices = @transform_1, window_bounds = array<i64: 32, 128>}, {pipeline_mode = #tpu.pipeline_mode<synchronous>, transform_indices = @transform_2, window_bounds = array<i64: 1, 128>}, {pipeline_mode = #tpu.pipeline_mode<synchronous>, transform_indices = @transform_3, window_bounds = array<i64: 1, 128>}, {pipeline_mode = #tpu.pipeline_mode<synchronous>, transform_indices = @transform_4, window_bounds = array<i64: 128, 128>}, {pipeline_mode = #tpu.pipeline_mode<synchronous>, transform_indices = @transform_5, window_bounds = array<i64: 1, 128>}, {transform_indices = @transform_6, window_bounds = array<i64: 256, 128>}]} {
    %c0 = arith.constant 0 : index
    %c0_0 = arith.constant 0 : index
    %0 = vector.load %arg1[%c0, %c0_0] : memref<256x32xf32, #tpu.memory_space<vmem>>, vector<256x32xf32>
    %c0_1 = arith.constant 0 : index
    %c0_2 = arith.constant 0 : index
    %1 = vector.load %arg2[%c0_1, %c0_2] : memref<32x128xf32, #tpu.memory_space<vmem>>, vector<32x128xf32>
    %cst = arith.constant dense<0.000000e+00> : vector<256x128xf32>
    %2 = tpu.matmul %0, %1, %cst {dimension_numbers = #tpu.dot_dimension_numbers<[1], [0], [0], [1], [0, 0, 1, 1], [], []>} : vector<256x32xf32>, vector<32x128xf32>, vector<256x128xf32> -> vector<256x128xf32>
    %c0_3 = arith.constant 0 : index
    %c0_4 = arith.constant 0 : index
    %3 = vector.load %arg3[%c0_3, %c0_4] : memref<1x128xf32, #tpu.memory_space<vmem>>, vector<1x128xf32>
    %4 = vector.broadcast %3 : vector<1x128xf32> to vector<256x128xf32>
    %5 = arith.mulf %2, %4 : vector<256x128xf32>
    %c0_5 = arith.constant 0 : index
    %c0_6 = arith.constant 0 : index
    %6 = vector.load %arg4[%c0_5, %c0_6] : memref<1x128xf32, #tpu.memory_space<vmem>>, vector<1x128xf32>
    %7 = vector.broadcast %6 : vector<1x128xf32> to vector<256x128xf32>
    %8 = arith.addf %5, %7 : vector<256x128xf32>
    %cst_7 = arith.constant 0.000000e+00 : f32
    %9 = vector.broadcast %cst_7 : f32 to vector<256x128xf32>
    %10 = arith.maximumf %8, %9 : vector<256x128xf32>
    %c0_8 = arith.constant 0 : index
    %c0_9 = arith.constant 0 : index
    %11 = vector.load %arg5[%c0_8, %c0_9] : memref<128x128xf32, #tpu.memory_space<vmem>>, vector<128x128xf32>
    %cst_10 = arith.constant dense<0.000000e+00> : vector<256x128xf32>
    %12 = tpu.matmul %10, %11, %cst_10 {dimension_numbers = #tpu.dot_dimension_numbers<[1], [0], [0], [1], [0, 0, 1, 1], [], []>} : vector<256x128xf32>, vector<128x128xf32>, vector<256x128xf32> -> vector<256x128xf32>
    %c0_11 = arith.constant 0 : index
    %c0_12 = arith.constant 0 : index
    %13 = vector.load %arg6[%c0_11, %c0_12] : memref<1x128xf32, #tpu.memory_space<vmem>>, vector<1x128xf32>
    %14 = vector.broadcast %13 : vector<1x128xf32> to vector<256x128xf32>
    %15 = arith.addf %12, %14 : vector<256x128xf32>
    %c0_13 = arith.constant 0 : index
    %c0_14 = arith.constant 0 : index
    %16 = vector.load %arg7[%c0_13, %c0_14] : memref<256x128xf32, #tpu.memory_space<vmem>>, vector<256x128xf32>
    tpu.vector_store %arg7[%c0_13, %c0_14], %15 {strides = array<i32>} : memref<256x128xf32, #tpu.memory_space<vmem>>, vector<256x128xf32>,
    return
  }
  func.func @transform_0(%arg0: i32) -> (i32, i32) {
    %c0_i32 = arith.constant 0 : i32
    %c0_i32_0 = arith.constant 0 : i32
    return %arg0, %c0_i32 : i32, i32
  }
  func.func @transform_1(%arg0: i32) -> (i32, i32) {
    %c0_i32 = arith.constant 0 : i32
    %c0_i32_0 = arith.constant 0 : i32
    %c0_i32_1 = arith.constant 0 : i32
    return %c0_i32, %c0_i32_0 : i32, i32
  }
  func.func @transform_2(%arg0: i32) -> (i32, i32) {
    %c0_i32 = arith.constant 0 : i32
    %c0_i32_0 = arith.constant 0 : i32
    %c0_i32_1 = arith.constant 0 : i32
    return %c0_i32, %c0_i32_0 : i32, i32
  }
  func.func @transform_3(%arg0: i32) -> (i32, i32) {
    %c0_i32 = arith.constant 0 : i32
    %c0_i32_0 = arith.constant 0 : i32
    %c0_i32_1 = arith.constant 0 : i32
    return %c0_i32, %c0_i32_0 : i32, i32
  }
  func.func @transform_4(%arg0: i32) -> (i32, i32) {
    %c0_i32 = arith.constant 0 : i32
    %c0_i32_0 = arith.constant 0 : i32
    %c0_i32_1 = arith.constant 0 : i32
    return %c0_i32, %c0_i32_0 : i32, i32
  }
  func.func @transform_5(%arg0: i32) -> (i32, i32) {
    %c0_i32 = arith.constant 0 : i32
    %c0_i32_0 = arith.constant 0 : i32
    %c0_i32_1 = arith.constant 0 : i32
    return %c0_i32, %c0_i32_0 : i32, i32
  }
  func.func @transform_6(%arg0: i32) -> (i32, i32) {
    %c0_i32 = arith.constant 0 : i32
    %c0_i32_0 = arith.constant 0 : i32
    return %arg0, %c0_i32 : i32, i32
  }
}

</mosaic_0001>

<bundles_post_ra>
// kernel: tpu_custom_call.1
= control target key start
LH: loop header
LB: loop body
LE: loop exit
PB: predicated region body
PF: predicated region fallthrough
CT: control target
= control target key end

     0   :  { %11 = vsyncpa [#allocation3], 0  ;;  %s1634_s0 = inlined_call_operand.hbm [shape: f32[256,32], index: 0, kind: input, shape index: {}]   ;;  %s1635_s1 = inlined_call_operand.hbm [shape: f32[32,128], index: 1, kind: input, shape index: {}]   ;;  %s1636_s2 = inlined_call_operand.hbm [shape: f32[1,128], index: 2, kind: input, shape index: {}]   ;;  %s1637_s3 = inlined_call_operand.hbm [shape: f32[1,128], index: 3, kind: input, shape index: {}]   ;;  %s1638_s4 = inlined_call_operand.hbm [shape: f32[128,128], index: 4, kind: input, shape index: {}]   ;;  %s1639_s5 = inlined_call_operand.hbm [shape: f32[1,128], index: 5, kind: input, shape index: {}]   ;;  %s1640_s6 = inlined_call_operand.hbm [shape: f32[256,128], index: 6, kind: output, shape index: {}]  }
   0x1   :  { %12 = vsyncpa [#allocation6], 0 }
   0x2   :  { %13 = vsyncpa [#allocation9], 0 }
   0x3   :  { %14 = vsyncpa [#allocation12], 0 }
   0x4   :  { %15 = vsyncpa [#allocation4], 0  ;;  %s1352_s21 = smov [#allocation5]   ;;  %s1353_s23 = smov [#allocation8]  }
   0x5   :  { %s33_s22 = sshll.u32 %s1352_s21, 4  ;;  %s56_s24 = sshll.u32 %s1353_s23, 4  ;;  %s34_s22 = int_to_ptr.vmem [resolvable:$true] %s33_s22  ;;  %s1396_s24 = int_to_ptr.vmem [resolvable:$true] %s56_s24 }
   0x6   :  { %s1188_s27 = scalar_lea.hbm %s1635_s1, 512 }
   0x7   :  { %p1189_p0 = scmp.ne.s32.totalorder %s1635_s1, %s1188_s27  ;;  %p1192_p1 = scmp.lt.u32.totalorder %s1188_s27, %s1635_s1 }
   0x9   :  { %p1194_p2 = pnand %p1192_p1, %p1189_p0 }
   0xb   :  { %1197 = shalt.err (!%p1194_p2)
}
   0xc   :  { %s1198_s8 = scalar_lea.vmem %s34_s22, 512  ;;  %p1203_p4 = scmp.lt.s32.totalorder %s34_s22, %s34_s22 }
   0xd   :  { %p1199_p3 = scmp.ne.s32.totalorder %s34_s22, %s1198_s8  ;;  %p1204_p5 = scmp.lt.s32.totalorder %s1198_s8, %s1198_s8 }
   0xf   :  { %p1205_p6 = por %p1204_p5, %p1203_p4 }
  0x11   :  { %p1206_p7 = pnand %p1205_p6, %p1199_p3 }
  0x13   :  { %1209 = shalt.err (!%p1206_p7)
}
  0x14   :  { %s1354_s9 = smov 128   ;;  %s1355_s10 = smov 8  }
  0x15   :  { %39 = dma.hbm_to_vmem [thread:$0]  %s1635_s1, 512, %s34_s22, [#allocation6], %s1354_s9, %s1354_s9, %s1355_s10  }
  0x16   :  { %s1210_s15 = scalar_lea.hbm %s1637_s3, 16 }
  0x17   :  { %p1211_p8 = scmp.ne.s32.totalorder %s1637_s3, %s1210_s15  ;;  %p1214_p9 = scmp.lt.u32.totalorder %s1210_s15, %s1637_s3 }
  0x19   :  { %p1216_p10 = pnand %p1214_p9, %p1211_p8 }
  0x1b   :  { %1219 = shalt.err (!%p1216_p10)
}
  0x1c   :  { %s1220_s20 = scalar_lea.vmem %s1396_s24, 16  ;;  %s1224_s1 = scalar_lea.vmem %s1396_s24, 32 }
  0x1d   :  { %p1221_p11 = scmp.ne.s32.totalorder %s1396_s24, %s1220_s20  ;;  %p1225_p12 = scmp.lt.s32.totalorder %s1396_s24, %s1396_s24 }
  0x1e   :  { %p1226_p13 = scmp.lt.s32.totalorder %s1224_s1, %s1220_s20 }
  0x20   :  { %p1227_p0 = por %p1226_p13, %p1225_p12 }
  0x22   :  { %p1228_p1 = pnand %p1227_p0, %p1221_p11 }
  0x24   :  { %1231 = shalt.err (!%p1228_p1)
}
  0x25   :  { %59 = dma.hbm_to_vmem [thread:$0]  %s1637_s3, 16, %s1396_s24, [#allocation9]  }
  0x26   :  { %s1356_s23 = smov [#allocation2]   ;;  %s1357_s26 = smov [#allocation7]  }
  0x27   :  { %s21_s25 = sshll.u32 %s1356_s23, 4  ;;  %s46_s27 = sshll.u32 %s1357_s26, 4  ;;  %s22_s25 = int_to_ptr.vmem [resolvable:$true] %s21_s25  ;;  %s47_s27 = int_to_ptr.vmem [resolvable:$true] %s46_s27 }
  0x28   :  { %s1232_s30 = scalar_lea.hbm %s1634_s0, 4096 }
  0x29   :  { %p1233_p2 = scmp.ne.s32.totalorder %s1634_s0, %s1232_s30  ;;  %p1236_p3 = scmp.lt.u32.totalorder %s1232_s30, %s1634_s0 }
  0x2b   :  { %p1238_p4 = pnand %p1236_p3, %p1233_p2 }
  0x2d   :  { %1241 = shalt.err (!%p1238_p4)
}
  0x2e   :  { %s1242_s3 = scalar_lea.vmem %s22_s25, 4096  ;;  %p1247_p6 = scmp.lt.s32.totalorder %s22_s25, %s22_s25 }
  0x2f   :  { %p1243_p5 = scmp.ne.s32.totalorder %s22_s25, %s1242_s3  ;;  %p1248_p7 = scmp.lt.s32.totalorder %s1242_s3, %s1242_s3 }
  0x31   :  { %p1249_p8 = por %p1248_p7, %p1247_p6 }
  0x33   :  { %p1250_p9 = pnand %p1249_p8, %p1243_p5 }
  0x35   :  { %1253 = shalt.err (!%p1250_p9)
}
  0x36   :  { %27 = dma.hbm_to_vmem [thread:$0]  %s1634_s0, 4096, %s22_s25, [#allocation3], %s1354_s9, %s1354_s9, %s1355_s10  }
  0x37   :  { %s1254_s16 = scalar_lea.hbm %s1636_s2, 16 }
  0x38   :  { %p1255_p10 = scmp.ne.s32.totalorder %s1636_s2, %s1254_s16  ;;  %p1258_p11 = scmp.lt.u32.totalorder %s1254_s16, %s1636_s2 }
  0x3a   :  { %p1260_p12 = pnand %p1258_p11, %p1255_p10 }
  0x3c   :  { %1263 = shalt.err (!%p1260_p12)
}
  0x3d   :  { %s1264_s1 = scalar_lea.vmem %s47_s27, 16  ;;  %s1268_s21 = scalar_lea.vmem %s47_s27, 32 }
  0x3e   :  { %p1265_p13 = scmp.ne.s32.totalorder %s47_s27, %s1264_s1  ;;  %p1269_p0 = scmp.lt.s32.totalorder %s47_s27, %s47_s27 }
  0x3f   :  { %p1270_p1 = scmp.lt.s32.totalorder %s1268_s21, %s1264_s1 }
  0x41   :  { %p1271_p2 = por %p1270_p1, %p1269_p0 }
  0x43   :  { %p1272_p3 = pnand %p1271_p2, %p1265_p13 }
  0x45   :  { %1275 = shalt.err (!%p1272_p3)
}
  0x46   :  { %49 = dma.hbm_to_vmem [thread:$0]  %s1636_s2, 16, %s47_s27, [#allocation6]  }
  0x47   :  { %s1358_s23 = smov [#allocation10]   ;;  %s1359_s26 = smov [#allocation11]  }
  0x48   :  { %s65_s25 = sshll.u32 %s1358_s23, 4  ;;  %s78_s28 = sshll.u32 %s1359_s26, 4  ;;  %s66_s25 = int_to_ptr.vmem [resolvable:$true] %s65_s25  ;;  %s79_s28 = int_to_ptr.vmem [resolvable:$true] %s78_s28 }
  0x49   :  { %s1276_s7 = scalar_lea.hbm %s1638_s4, 2048 }
  0x4a   :  { %p1277_p4 = scmp.ne.s32.totalorder %s1638_s4, %s1276_s7  ;;  %p1280_p5 = scmp.lt.u32.totalorder %s1276_s7, %s1638_s4 }
  0x4c   :  { %p1282_p6 = pnand %p1280_p5, %p1277_p4 }
  0x4e   :  { %1285 = shalt.err (!%p1282_p6)
}
  0x4f   :  { %s1286_s2 = scalar_lea.vmem %s66_s25, 2048  ;;  %p1291_p8 = scmp.lt.s32.totalorder %s66_s25, %s66_s25 }
  0x50   :  { %p1287_p7 = scmp.ne.s32.totalorder %s66_s25, %s1286_s2  ;;  %p1292_p9 = scmp.lt.s32.totalorder %s1286_s2, %s1286_s2 }
  0x52   :  { %p1293_p10 = por %p1292_p9, %p1291_p8 }
  0x54   :  { %p1294_p11 = pnand %p1293_p10, %p1287_p7 }
  0x56   :  { %1297 = shalt.err (!%p1294_p11)
}
  0x57   :  { %71 = dma.hbm_to_vmem [thread:$0]  %s1638_s4, 2048, %s66_s25, [#allocation9], %s1354_s9, %s1354_s9, %s1355_s10  }
  0x58   :  { %s1298_s15 = scalar_lea.hbm %s1639_s5, 16 }
  0x59   :  { %p1299_p12 = scmp.ne.s32.totalorder %s1639_s5, %s1298_s15  ;;  %p1302_p13 = scmp.lt.u32.totalorder %s1298_s15, %s1639_s5 }
  0x5b   :  { %p1304_p0 = pnand %p1302_p13, %p1299_p12 }
  0x5d   :  { %1307 = shalt.err (!%p1304_p0)
}
  0x5e   :  { %s1308_s20 = scalar_lea.vmem %s79_s28, 16  ;;  %s1312_s1 = scalar_lea.vmem %s79_s28, 32 }
  0x5f   :  { %p1309_p1 = scmp.ne.s32.totalorder %s79_s28, %s1308_s20  ;;  %p1313_p2 = scmp.lt.s32.totalorder %s79_s28, %s79_s28 }
  0x60   :  { %p1314_p3 = scmp.lt.s32.totalorder %s1312_s1, %s1308_s20 }
  0x62   :  { %p1315_p4 = por %p1314_p3, %p1313_p2 }
  0x64   :  { %p1316_p5 = pnand %p1315_p4, %p1309_p1 }
  0x66   :  { %1319 = shalt.err (!%p1316_p5)
}
  0x67   :  { %81 = dma.hbm_to_vmem [thread:$0]  %s1639_s5, 16, %s79_s28, [#allocation12]  }
  0x68   :  { %1342 = dma.done.wait [#allocation3], 4096  }
  0x69   :  { %1343 = vsyncadd [#allocation3], 4294963200 }
  0x6a   :  { %1344 = dma.done.wait [#allocation6], 528  }
  0x6b   :  { %1345 = vsyncadd [#allocation6], 4294966768 }
  0x6c   :  { %1346 = dma.done.wait [#allocation9], 2064  }
  0x6d   :  { %1347 = vsyncadd [#allocation9], 4294965232 }
  0x6e   :  { %1348 = dma.done.wait [#allocation12], 16  }
  0x6f   :  { %1349 = vsyncadd [#allocation12], 4294967280  ;;  %vm136_vm0 = vcmask 261120   ;;  %v132_v0 = vld [vmem:[#allocation5] sm:$0xff]  ;;  %v133_v1 = vld [vmem:[#allocation5 + $0x8] sm:$0xff]  ;;  %s1360_s5 = smov [#allocation13]  }
  0x70   :  { %v134_v2 = vld [vmem:[#allocation5 + $0x10] sm:$0xff]  ;;  %v1123_v3 = vpack.c.bf16 %v133_v1, %v132_v0  ;;  %v135_v4 = vld [vmem:[#allocation5 + $0x18] sm:$0xff]  ;;  %v100_v5 = vld [vmem:[#allocation2] sm:$0xff]  ;;  %s853_s0 = sshll.u32 %s1360_s5, 4  ;;  %s854_s0 = int_to_ptr.vmem [resolvable:$true] %s853_s0 }
  0x71   :  { %v1127_v6 = vpack.c.bf16 %v135_v4, %v134_v2  ;;  %995 = vmatprep.mubr.msk.f32.mxu0 %vm136_vm0, %v100_v5  ;;  %v101_v7 = vld [vmem:[#allocation2 + $0x8] sm:$0xff]  ;;  %v102_v8 = vld [vmem:[#allocation2 + $0x10] sm:$0xff]  ;;  %v103_v9 = vld [vmem:[#allocation2 + $0x18] sm:$0xff]  ;;  %s1320_s22 = scalar_lea.vmem %s854_s0, 4096  ;;  %p1325_p7 = scmp.lt.s32.totalorder %s854_s0, %s854_s0 }
  0x72   :  { %1124 = vmatprep.subr.bf16.mxu0 %v1123_v3  ;;  %v568_v10 = vld [vmem:[#allocation10] sm:$0xff]  ;;  %v569_v11 = vld [vmem:[#allocation10 + $0x8] sm:$0xff]  ;;  %v570_v12 = vld [vmem:[#allocation10 + $0x10] sm:$0xff]  ;;  %p1321_p6 = scmp.ne.s32.totalorder %s854_s0, %s1320_s22  ;;  %p1326_p8 = scmp.lt.s32.totalorder %s1320_s22, %s1320_s22 }
  0x73   :  { %1126 = vmatpush3.bf16.msra.mxu0 %v1123_v3  ;;  %v104_v13 = vld [vmem:[#allocation2 + $0x20] sm:$0xff]  ;;  %v1131_v14 = vpack.c.bf16 %v569_v11, %v568_v10  ;;  %v573_v18 = vld [vmem:[#allocation10 + $0x28] sm:$0xff]  ;;  %v574_v22 = vld [vmem:[#allocation10 + $0x30] sm:$0xff] }
  0x74   :  { %1128 = vmatprep.subr.bf16.mxu0 %v1127_v6  ;;  %v571_v15 = vld [vmem:[#allocation10 + $0x18] sm:$0xff]  ;;  %v572_v17 = vld [vmem:[#allocation10 + $0x20] sm:$0xff]  ;;  %v106_v20 = vld [vmem:[#allocation2 + $0x30] sm:$0xff]  ;;  %p1327_p9 = por %p1326_p8, %p1325_p7 }
  0x75   :  { %v1135_v16 = vpack.c.bf16 %v571_v15, %v570_v12  ;;  %v105_v19 = vld [vmem:[#allocation2 + $0x28] sm:$0xff]  ;;  %v1139_v21 = vpack.c.bf16 %v573_v18, %v572_v17  ;;  %1163 = vmatprep.subr.bf16.mxu1 %v1131_v14  ;;  %v575_v23 = vld [vmem:[#allocation10 + $0x38] sm:$0xff]  ;;  %v110_v30 = vld [vmem:[#allocation2 + $0x50] sm:$0xff] }
  0x76   :  { %1171 = vmatpush3.bf16.msra.mxu1 %v1131_v14  ;;  %v107_v24 = vld [vmem:[#allocation2 + $0x38] sm:$0xff]  ;;  %v108_v25 = vld [vmem:[#allocation2 + $0x40] sm:$0xff]  ;;  %v1143_v26 = vpack.c.bf16 %v575_v23, %v574_v22  ;;  %v577_v28 = vld [vmem:[#allocation10 + $0x48] sm:$0xff]  ;;  %p1328_p10 = pnand %p1327_p9, %p1321_p6 }
  0x77   :  { %1130 = vmatpush3.bf16.msra.mxu0 %v1127_v6  ;;  %1164 = vmatprep.subr.bf16.mxu1 %v1135_v16  ;;  %v576_v27 = vld [vmem:[#allocation10 + $0x40] sm:$0xff]  ;;  %v578_v32 = vld [vmem:[#allocation10 + $0x50] sm:$0xff]  ;;  %v579_v33 = vld [vmem:[#allocation10 + $0x58] sm:$0xff] }
  0x78   :  { %1132 = vmatprep.subr.bf16.mxu0 %v1131_v14  ;;  %v109_v29 = vld [vmem:[#allocation2 + $0x48] sm:$0xff]  ;;  %v1147_v31 = vpack.c.bf16 %v577_v28, %v576_v27  ;;  %v111_v34 = vld [vmem:[#allocation2 + $0x58] sm:$0xff]  ;;  %v112_v35 = vld [vmem:[#allocation2 + $0x60] sm:$0xff]  ;;  %v1151_v36 = vpack.c.bf16 %v579_v33, %v578_v32 }
  0x79   :  { %v113_v37 = vld [vmem:[#allocation2 + $0x68] sm:$0xff]  ;;  %v114_v38 = vld [vmem:[#allocation2 + $0x70] sm:$0xff]  ;;  %v115_v39 = vld [vmem:[#allocation2 + $0x78] sm:$0xff] }
  0x7a   :  { %996 = vmatmul.mubr.msk.f32.vlgmr.msra.gmra.mrb[0].mxu0 %vm136_vm0, %v101_v7  ;;  %1172 = vmatpush3.bf16.msra.mxu1 %v1135_v16  ;;  %v116_v40 = vld [vmem:[#allocation2 + $0x80] sm:$0xff]  ;;  %v117_v41 = vld [vmem:[#allocation2 + $0x88] sm:$0xff]  ;;  %v118_v42 = vld [vmem:[#allocation2 + $0x90] sm:$0xff] }
  0x7b   :  { %998 = vmatprep.mubr.msk.f32.mxu0 %vm136_vm0, %v102_v8  ;;  %1134 = vmatpush3.bf16.msra.mxu0 %v1131_v14  ;;  %v119_v43 = vld [vmem:[#allocation2 + $0x98] sm:$0xff]  ;;  %v120_v44 = vld [vmem:[#allocation2 + $0xa0] sm:$0xff]  ;;  %v121_v45 = vld [vmem:[#allocation2 + $0xa8] sm:$0xff] }
  0x7c   :  { %1136 = vmatprep.subr.bf16.mxu0 %v1135_v16  ;;  %1165 = vmatprep.subr.bf16.mxu1 %v1139_v21  ;;  %v122_v46 = vld [vmem:[#allocation2 + $0xb0] sm:$0xff]  ;;  %v123_v47 = vld [vmem:[#allocation2 + $0xb8] sm:$0xff]  ;;  %v124_v48 = vld [vmem:[#allocation2 + $0xc0] sm:$0xff] }
  0x7d   :  { %v125_v49 = vld [vmem:[#allocation2 + $0xc8] sm:$0xff]  ;;  %v126_v50 = vld [vmem:[#allocation2 + $0xd0] sm:$0xff]  ;;  %v127_v51 = vld [vmem:[#allocation2 + $0xd8] sm:$0xff] }
  0x7e   :  { %999 = vmatmul.mubr.msk.f32.gmra.mrb[2].mxu0 %vm136_vm0, %v103_v9  ;;  %1173 = vmatpush3.bf16.msra.mxu1 %v1139_v21  ;;  %v128_v52 = vld [vmem:[#allocation2 + $0xe0] sm:$0xff]  ;;  %v129_v53 = vld [vmem:[#allocation2 + $0xe8] sm:$0xff]  ;;  %v130_v54 = vld [vmem:[#allocation2 + $0xf0] sm:$0xff] }
  0x7f   :  { %1001 = vmatprep.mubr.msk.f32.mxu0 %vm136_vm0, %v104_v13  ;;  %1138 = vmatpush3.bf16.msra.mxu0 %v1135_v16  ;;  %v131_v55 = vld [vmem:[#allocation2 + $0xf8] sm:$0xff]  ;;  %v580_v56 = vld [vmem:[#allocation10 + $0x60] sm:$0xff]  ;;  %v581_v57 = vld [vmem:[#allocation10 + $0x68] sm:$0xff] }
  0x80   :  { %1140 = vmatprep.subr.bf16.mxu0 %v1139_v21  ;;  %1166 = vmatprep.subr.bf16.mxu1 %v1143_v26  ;;  %v1155_v58 = vpack.c.bf16 %v581_v57, %v580_v56  ;;  %v582_v59 = vld [vmem:[#allocation10 + $0x70] sm:$0xff]  ;;  %v583_v60 = vld [vmem:[#allocation10 + $0x78] sm:$0xff] }
  0x81   :  { %v1159_v61 = vpack.c.bf16 %v583_v60, %v582_v59  ;;  %v1517_v62 = vld [vmem:[#allocation7] ss:$0 sm:$0xff]  ;;  %v1519_v0 = vld [vmem:[#allocation8] ss:$0 sm:$0xff] }
  0x82   :  { %1002 = vmatmul.mubr.msk.f32.gmra.mrb[4].mxu0 %vm136_vm0, %v105_v19  ;;  %1174 = vmatpush3.bf16.msra.mxu1 %v1143_v26 }
  0x83   :  { %1004 = vmatprep.mubr.msk.f32.mxu0 %vm136_vm0, %v106_v20  ;;  %1142 = vmatpush3.bf16.msra.mxu0 %v1139_v21 }
  0x84   :  { %1144 = vmatprep.subr.bf16.mxu0 %v1143_v26  ;;  %1167 = vmatprep.subr.bf16.mxu1 %v1147_v31 }
  0x86   :  { %1005 = vmatmul.mubr.msk.f32.gmra.mrb[6].mxu0 %vm136_vm0, %v107_v24  ;;  %1175 = vmatpush3.bf16.msra.mxu1 %v1147_v31 }
  0x87   :  { %1007 = vmatprep.mubr.msk.f32.mxu0 %vm136_vm0, %v108_v25  ;;  %1146 = vmatpush3.bf16.msra.mxu0 %v1143_v26 }
  0x88   :  { %1148 = vmatprep.subr.bf16.mxu0 %v1147_v31  ;;  %1168 = vmatprep.subr.bf16.mxu1 %v1151_v36 }
  0x8a   :  { %1008 = vmatmul.mubr.msk.f32.gmra.mrb[8].mxu0 %vm136_vm0, %v109_v29  ;;  %1176 = vmatpush3.bf16.msra.mxu1 %v1151_v36 }
  0x8b   :  { %1010 = vmatprep.mubr.msk.f32.mxu0 %vm136_vm0, %v110_v30  ;;  %1150 = vmatpush3.bf16.msra.mxu0 %v1147_v31 }
  0x8c   :  { %1152 = vmatprep.subr.bf16.mxu0 %v1151_v36  ;;  %1169 = vmatprep.subr.bf16.mxu1 %v1155_v58 }
  0x8e   :  { %1011 = vmatmul.mubr.msk.f32.gmra.mrb[10].mxu0 %vm136_vm0, %v111_v34  ;;  %1177 = vmatpush3.bf16.msra.mxu1 %v1155_v58 }
  0x8f   :  { %1013 = vmatprep.mubr.msk.f32.mxu0 %vm136_vm0, %v112_v35  ;;  %1154 = vmatpush3.bf16.msra.mxu0 %v1151_v36 }
  0x90   :  { %1156 = vmatprep.subr.bf16.mxu0 %v1155_v58  ;;  %1170 = vmatprep.subr.bf16.mxu1 %v1159_v61 }
  0x92   :  { %1014 = vmatmul.mubr.msk.f32.gmra.mrb[12].mxu0 %vm136_vm0, %v113_v37  ;;  %1178 = vmatpush3.bf16.msra.mxu1 %v1159_v61 }
  0x93   :  { %1016 = vmatprep.mubr.msk.f32.mxu0 %vm136_vm0, %v114_v38  ;;  %1158 = vmatpush3.bf16.msra.mxu0 %v1155_v58 }
  0x94   :  { %1160 = vmatprep.subr.bf16.mxu0 %v1159_v61 }
  0x96   :  { %1017 = vmatmul.mubr.msk.f32.gmra.mrb[14].mxu0 %vm136_vm0, %v115_v39 }
  0x97   :  { %1019 = vmatprep.mubr.msk.f32.mxu0 %vm136_vm0, %v116_v40  ;;  %1162 = vmatpush3.bf16.msra.mxu0 %v1159_v61 }
  0x9a   :  { %1020 = vmatmul.mubr.msk.f32.gmra.mrb[16].mxu0 %vm136_vm0, %v117_v41 }
  0x9b   :  { %1022 = vmatprep.mubr.msk.f32.mxu0 %vm136_vm0, %v118_v42 }
  0x9e   :  { %1023 = vmatmul.mubr.msk.f32.gmra.mrb[18].mxu0 %vm136_vm0, %v119_v43 }
  0x9f   :  { %1025 = vmatprep.mubr.msk.f32.mxu0 %vm136_vm0, %v120_v44 }
  0xa2   :  { %1026 = vmatmul.mubr.msk.f32.gmra.mrb[20].mxu0 %vm136_vm0, %v121_v45 }
  0xa3   :  { %1028 = vmatprep.mubr.msk.f32.mxu0 %vm136_vm0, %v122_v46 }
  0xa6   :  { %1029 = vmatmul.mubr.msk.f32.gmra.mrb[22].mxu0 %vm136_vm0, %v123_v47 }
  0xa7   :  { %1031 = vmatprep.mubr.msk.f32.mxu0 %vm136_vm0, %v124_v48 }
  0xaa   :  { %1032 = vmatmul.mubr.msk.f32.gmra.mrb[24].mxu0 %vm136_vm0, %v125_v49 }
  0xab   :  { %1034 = vmatprep.mubr.msk.f32.mxu0 %vm136_vm0, %v126_v50 }
  0xae   :  { %1035 = vmatmul.mubr.msk.f32.gmra.mrb[26].mxu0 %vm136_vm0, %v127_v51 }
  0xaf   :  { %1037 = vmatprep.mubr.msk.f32.mxu0 %vm136_vm0, %v128_v52 }
  0xb2   :  { %1038 = vmatmul.mubr.msk.f32.gmra.mrb[28].mxu0 %vm136_vm0, %v129_v53 }
  0xb3   :  { %1040 = vmatprep.mubr.msk.f32.mxu0 %vm136_vm0, %v130_v54 }
  0xb6   :  { %1041 = vmatmul.mubr.msk.f32.gmra.mrb[30].mxu0 %vm136_vm0, %v131_v55 }
 0x14d   :  { %v997_v63 = vpop.f32.mrb[0].mxu0 }
 0x14e   :  { %v466_v1 = vmul.f32 %v997_v63, %v1517_v62  ;;  %v299_v2 = vpop.f32.mrb[1].mxu0 }
 0x14f   :  { %v465_v3 = vmul.f32 %v1517_v62, %v299_v2 }
 0x150   :  { %v505_v4 = vadd.f32 %v1519_v0, %v466_v1 }
 0x151   :  { %v504_v5 = vadd.f32 %v1519_v0, %v465_v3  ;;  %v1000_v6 = vpop.f32.mrb[2].mxu0 }
 0x152   :  { %v468_v7 = vmul.f32 %v1000_v6, %v1517_v62  ;;  %v309_v8 = vpop.f32.mrb[3].mxu0  ;;  %v537_v11 = vmax.f32 %v505_v4, 0.0 }
 0x153   :  { %v536_v9 = vmax.f32 %v504_v5, 0.0  ;;  %v467_v10 = vmul.f32 %v1517_v62, %v309_v8 }
 0x154   :  { %v507_v12 = vadd.f32 %v1519_v0, %v468_v7 }
 0x155   :  { %v506_v13 = vadd.f32 %v1519_v0, %v467_v10  ;;  %v1003_v14 = vpop.f32.mrb[4].mxu0  ;;  %1075 = vmatprep.mubr.f32.mxu0 %v536_v9 }
 0x156   :  { %v470_v15 = vmul.f32 %v1003_v14, %v1517_v62  ;;  %v319_v16 = vpop.f32.mrb[5].mxu0  ;;  %1076 = vmatmul.mubr.f32.vlgmr.msra.gmra.mrb[32].mxu0 %v537_v11  ;;  %v539_v19 = vmax.f32 %v507_v12, 0.0 }
 0x157   :  { %v538_v17 = vmax.f32 %v506_v13, 0.0  ;;  %v469_v18 = vmul.f32 %v1517_v62, %v319_v16 }
 0x158   :  { %v509_v20 = vadd.f32 %v1519_v0, %v470_v15 }
 0x159   :  { %v508_v21 = vadd.f32 %v1519_v0, %v469_v18  ;;  %v1006_v22 = vpop.f32.mrb[6].mxu0  ;;  %1078 = vmatprep.mubr.f32.mxu0 %v538_v17 }
 0x15a   :  { %v472_v23 = vmul.f32 %v1006_v22, %v1517_v62  ;;  %v329_v24 = vpop.f32.mrb[7].mxu0  ;;  %1079 = vmatmul.mubr.f32.gmra.mrb[34].mxu0 %v539_v19  ;;  %v541_v27 = vmax.f32 %v509_v20, 0.0 }
 0x15b   :  { %v540_v25 = vmax.f32 %v508_v21, 0.0  ;;  %v471_v26 = vmul.f32 %v1517_v62, %v329_v24 }
 0x15c   :  { %v511_v28 = vadd.f32 %v1519_v0, %v472_v23 }
 0x15d   :  { %v1009_v29 = vpop.f32.mrb[8].mxu0  ;;  %1081 = vmatprep.mubr.f32.mxu0 %v540_v25  ;;  %v510_v30 = vadd.f32 %v1519_v0, %v471_v26 }
 0x15e   :  { %v474_v31 = vmul.f32 %v1009_v29, %v1517_v62  ;;  %v339_v32 = vpop.f32.mrb[9].mxu0  ;;  %1082 = vmatmul.mubr.f32.gmra.mrb[36].mxu0 %v541_v27  ;;  %v543_v35 = vmax.f32 %v511_v28, 0.0 }
 0x15f   :  { %v473_v33 = vmul.f32 %v1517_v62, %v339_v32  ;;  %v542_v34 = vmax.f32 %v510_v30, 0.0 }
 0x160   :  { %v513_v36 = vadd.f32 %v1519_v0, %v474_v31 }
 0x161   :  { %v512_v37 = vadd.f32 %v1519_v0, %v473_v33  ;;  %v1012_v38 = vpop.f32.mrb[10].mxu0  ;;  %1084 = vmatprep.mubr.f32.mxu1 %v542_v34 }
 0x162   :  { %v476_v39 = vmul.f32 %v1012_v38, %v1517_v62  ;;  %v349_v40 = vpop.f32.mrb[11].mxu0  ;;  %1085 = vmatmul.mubr.f32.vlgmr.msra.gmra.mrb[0].mxu1 %v543_v35  ;;  %v545_v43 = vmax.f32 %v513_v36, 0.0 }
 0x163   :  { %v544_v41 = vmax.f32 %v512_v37, 0.0  ;;  %v475_v42 = vmul.f32 %v1517_v62, %v349_v40 }
 0x164   :  { %v515_v44 = vadd.f32 %v1519_v0, %v476_v39 }
 0x165   :  { %v514_v45 = vadd.f32 %v1519_v0, %v475_v42  ;;  %v1015_v46 = vpop.f32.mrb[12].mxu0  ;;  %1087 = vmatprep.mubr.f32.mxu1 %v544_v41 }
 0x166   :  { %v478_v47 = vmul.f32 %v1015_v46, %v1517_v62  ;;  %v359_v48 = vpop.f32.mrb[13].mxu0  ;;  %1088 = vmatmul.mubr.f32.gmra.mrb[2].mxu1 %v545_v43  ;;  %v547_v51 = vmax.f32 %v515_v44, 0.0 }
 0x167   :  { %v546_v49 = vmax.f32 %v514_v45, 0.0  ;;  %v477_v50 = vmul.f32 %v1517_v62, %v359_v48 }
 0x168   :  { %v517_v52 = vadd.f32 %v1519_v0, %v478_v47 }
 0x169   :  { %v516_v53 = vadd.f32 %v1519_v0, %v477_v50  ;;  %v1018_v54 = vpop.f32.mrb[14].mxu0  ;;  %1090 = vmatprep.mubr.f32.mxu1 %v546_v49 }
 0x16a   :  { %v480_v55 = vmul.f32 %v1018_v54, %v1517_v62  ;;  %v369_v56 = vpop.f32.mrb[15].mxu0  ;;  %1091 = vmatmul.mubr.f32.gmra.mrb[4].mxu1 %v547_v51  ;;  %v549_v59 = vmax.f32 %v517_v52, 0.0 }
 0x16b   :  { %v548_v57 = vmax.f32 %v516_v53, 0.0  ;;  %v479_v58 = vmul.f32 %v1517_v62, %v369_v56 }
 0x16c   :  { %v519_v60 = vadd.f32 %v1519_v0, %v480_v55 }
 0x16d   :  { %v518_v61 = vadd.f32 %v1519_v0, %v479_v58  ;;  %v1021_v63 = vpop.f32.mrb[16].mxu0  ;;  %1093 = vmatprep.mubr.f32.mxu1 %v548_v57 }
 0x16e   :  { %v482_v1 = vmul.f32 %v1021_v63, %v1517_v62  ;;  %v379_v2 = vpop.f32.mrb[17].mxu0  ;;  %1094 = vmatmul.mubr.f32.gmra.mrb[6].mxu1 %v549_v59  ;;  %v551_v5 = vmax.f32 %v519_v60, 0.0 }
 0x16f   :  { %v550_v3 = vmax.f32 %v518_v61, 0.0  ;;  %v481_v4 = vmul.f32 %v1517_v62, %v379_v2 }
 0x170   :  { %v521_v6 = vadd.f32 %v1519_v0, %v482_v1 }
 0x171   :  { %v520_v7 = vadd.f32 %v1519_v0, %v481_v4  ;;  %v1024_v8 = vpop.f32.mrb[18].mxu0  ;;  %1096 = vmatprep.mubr.f32.mxu1 %v550_v3  ;;  %v1585_v4 = vld [vmem:[#allocation11] ss:$0 sm:$0xff] }
 0x172   :  { %v484_v9 = vmul.f32 %v1024_v8, %v1517_v62  ;;  %v389_v10 = vpop.f32.mrb[19].mxu0  ;;  %1097 = vmatmul.mubr.f32.gmra.mrb[8].mxu1 %v551_v5  ;;  %v553_v13 = vmax.f32 %v521_v6, 0.0 }
 0x173   :  { %v552_v11 = vmax.f32 %v520_v7, 0.0  ;;  %v483_v12 = vmul.f32 %v1517_v62, %v389_v10 }
 0x174   :  { %v523_v14 = vadd.f32 %v1519_v0, %v484_v9 }
 0x175   :  { %v522_v15 = vadd.f32 %v1519_v0, %v483_v12  ;;  %v1027_v16 = vpop.f32.mrb[20].mxu0  ;;  %1099 = vmatprep.mubr.f32.mxu1 %v552_v11 }
 0x176   :  { %v486_v17 = vmul.f32 %v1027_v16, %v1517_v62  ;;  %v399_v18 = vpop.f32.mrb[21].mxu0  ;;  %1100 = vmatmul.mubr.f32.gmra.mrb[10].mxu1 %v553_v13  ;;  %v555_v21 = vmax.f32 %v523_v14, 0.0 }
 0x177   :  { %v554_v19 = vmax.f32 %v522_v15, 0.0  ;;  %v485_v20 = vmul.f32 %v1517_v62, %v399_v18 }
 0x178   :  { %v525_v22 = vadd.f32 %v1519_v0, %v486_v17 }
 0x179   :  { %v524_v23 = vadd.f32 %v1519_v0, %v485_v20  ;;  %v1030_v24 = vpop.f32.mrb[22].mxu0  ;;  %1102 = vmatprep.mubr.f32.mxu1 %v554_v19 }
 0x17a   :  { %v488_v25 = vmul.f32 %v1030_v24, %v1517_v62  ;;  %v409_v26 = vpop.f32.mrb[23].mxu0  ;;  %1103 = vmatmul.mubr.f32.gmra.mrb[12].mxu1 %v555_v21  ;;  %v557_v29 = vmax.f32 %v525_v22, 0.0 }
 0x17b   :  { %v556_v27 = vmax.f32 %v524_v23, 0.0  ;;  %v487_v28 = vmul.f32 %v1517_v62, %v409_v26 }
 0x17c   :  { %v527_v30 = vadd.f32 %v1519_v0, %v488_v25 }
 0x17d   :  { %v526_v31 = vadd.f32 %v1519_v0, %v487_v28  ;;  %v1033_v32 = vpop.f32.mrb[24].mxu0  ;;  %1105 = vmatprep.mubr.f32.mxu1 %v556_v27 }
 0x17e   :  { %v490_v33 = vmul.f32 %v1033_v32, %v1517_v62  ;;  %v419_v34 = vpop.f32.mrb[25].mxu0  ;;  %1106 = vmatmul.mubr.f32.gmra.mrb[14].mxu1 %v557_v29  ;;  %v559_v37 = vmax.f32 %v527_v30, 0.0 }
 0x17f   :  { %v558_v35 = vmax.f32 %v526_v31, 0.0  ;;  %v489_v36 = vmul.f32 %v1517_v62, %v419_v34 }
 0x180   :  { %v529_v38 = vadd.f32 %v1519_v0, %v490_v33 }
 0x181   :  { %v528_v39 = vadd.f32 %v1519_v0, %v489_v36  ;;  %v1036_v40 = vpop.f32.mrb[26].mxu0  ;;  %1108 = vmatprep.mubr.f32.mxu1 %v558_v35 }
 0x182   :  { %v492_v41 = vmul.f32 %v1036_v40, %v1517_v62  ;;  %v429_v42 = vpop.f32.mrb[27].mxu0  ;;  %1109 = vmatmul.mubr.f32.gmra.mrb[16].mxu1 %v559_v37  ;;  %v561_v45 = vmax.f32 %v529_v38, 0.0 }
 0x183   :  { %v560_v43 = vmax.f32 %v528_v39, 0.0  ;;  %v491_v44 = vmul.f32 %v1517_v62, %v429_v42 }
 0x184   :  { %v531_v46 = vadd.f32 %v1519_v0, %v492_v41 }
 0x185   :  { %v530_v47 = vadd.f32 %v1519_v0, %v491_v44  ;;  %v1039_v48 = vpop.f32.mrb[28].mxu0  ;;  %1111 = vmatprep.mubr.f32.mxu1 %v560_v43 }
 0x186   :  { %v494_v49 = vmul.f32 %v1039_v48, %v1517_v62  ;;  %v439_v50 = vpop.f32.mrb[29].mxu0  ;;  %1112 = vmatmul.mubr.f32.gmra.mrb[18].mxu1 %v561_v45  ;;  %v563_v53 = vmax.f32 %v531_v46, 0.0 }
 0x187   :  { %v562_v51 = vmax.f32 %v530_v47, 0.0  ;;  %v493_v52 = vmul.f32 %v1517_v62, %v439_v50 }
 0x188   :  { %v533_v54 = vadd.f32 %v1519_v0, %v494_v49 }
 0x189   :  { %v532_v55 = vadd.f32 %v1519_v0, %v493_v52  ;;  %v1042_v56 = vpop.f32.mrb[30].mxu0  ;;  %1114 = vmatprep.mubr.f32.mxu1 %v562_v51 }
 0x18a   :  { %v496_v57 = vmul.f32 %v1042_v56, %v1517_v62  ;;  %v449_v58 = vpop.f32.mrb[31].mxu0  ;;  %1115 = vmatmul.mubr.f32.gmra.mrb[20].mxu1 %v563_v53  ;;  %v565_v61 = vmax.f32 %v533_v54, 0.0 }
 0x18b   :  { %v564_v59 = vmax.f32 %v532_v55, 0.0  ;;  %v495_v60 = vmul.f32 %v1517_v62, %v449_v58 }
 0x18c   :  { %v535_v63 = vadd.f32 %v1519_v0, %v496_v57 }
 0x18d   :  { %v534_v1 = vadd.f32 %v1519_v0, %v495_v60  ;;  %1117 = vmatprep.mubr.f32.mxu1 %v564_v59 }
 0x18e   :  { %1118 = vmatmul.mubr.f32.gmra.mrb[22].mxu1 %v565_v61  ;;  %v567_v3 = vmax.f32 %v535_v63, 0.0 }
 0x18f   :  { %v566_v2 = vmax.f32 %v534_v1, 0.0 }
 0x191   :  { %1120 = vmatprep.mubr.f32.mxu1 %v566_v2 }
 0x192   :  { %1121 = vmatmul.mubr.f32.gmra.mrb[24].mxu1 %v567_v3 }
 0x229   :  { %v1077_v5 = vpop.f32.mrb[32].mxu0 }
 0x22a   :  { %v663_v6 = vadd.f32 %v1077_v5, %v1585_v4  ;;  %v657_v7 = vpop.f32.mrb[33].mxu0 }
 0x22b   :  { %v658_v8 = vadd.f32 %v1585_v4, %v657_v7 }
 0x22c   :  { %817 = vst [vmem:[#allocation13 + $0x8] sm:$0xff] %v663_v6 }
 0x22d   :  { %816 = vst [vmem:[#allocation13] sm:$0xff] %v658_v8  ;;  %v1080_v62 = vpop.f32.mrb[34].mxu0 }
 0x22e   :  { %v673_v9 = vadd.f32 %v1080_v62, %v1585_v4  ;;  %v667_v0 = vpop.f32.mrb[35].mxu0 }
 0x22f   :  { %v668_v10 = vadd.f32 %v1585_v4, %v667_v0 }
 0x230   :  { %819 = vst [vmem:[#allocation13 + $0x18] sm:$0xff] %v673_v9 }
 0x231   :  { %818 = vst [vmem:[#allocation13 + $0x10] sm:$0xff] %v668_v10  ;;  %v1083_v11 = vpop.f32.mrb[36].mxu0 }
 0x232   :  { %v683_v12 = vadd.f32 %v1083_v11, %v1585_v4  ;;  %v677_v13 = vpop.f32.mrb[37].mxu0 }
 0x233   :  { %v678_v14 = vadd.f32 %v1585_v4, %v677_v13 }
 0x234   :  { %821 = vst [vmem:[#allocation13 + $0x28] sm:$0xff] %v683_v12 }
 0x235   :  { %820 = vst [vmem:[#allocation13 + $0x20] sm:$0xff] %v678_v14  ;;  %v1086_v15 = vpop.f32.mrb[0].mxu1 }
 0x236   :  { %v693_v16 = vadd.f32 %v1086_v15, %v1585_v4  ;;  %v687_v17 = vpop.f32.mrb[1].mxu1 }
 0x237   :  { %v688_v18 = vadd.f32 %v1585_v4, %v687_v17 }
 0x238   :  { %823 = vst [vmem:[#allocation13 + $0x38] sm:$0xff] %v693_v16 }
 0x239   :  { %822 = vst [vmem:[#allocation13 + $0x30] sm:$0xff] %v688_v18  ;;  %v1089_v19 = vpop.f32.mrb[2].mxu1 }
 0x23a   :  { %v703_v20 = vadd.f32 %v1089_v19, %v1585_v4  ;;  %v697_v21 = vpop.f32.mrb[3].mxu1 }
 0x23b   :  { %v698_v22 = vadd.f32 %v1585_v4, %v697_v21 }
 0x23c   :  { %825 = vst [vmem:[#allocation13 + $0x48] sm:$0xff] %v703_v20 }
 0x23d   :  { %824 = vst [vmem:[#allocation13 + $0x40] sm:$0xff] %v698_v22  ;;  %v1092_v23 = vpop.f32.mrb[4].mxu1 }
 0x23e   :  { %v713_v24 = vadd.f32 %v1092_v23, %v1585_v4  ;;  %v707_v25 = vpop.f32.mrb[5].mxu1 }
 0x23f   :  { %v708_v26 = vadd.f32 %v1585_v4, %v707_v25 }
 0x240   :  { %827 = vst [vmem:[#allocation13 + $0x58] sm:$0xff] %v713_v24 }
 0x241   :  { %826 = vst [vmem:[#allocation13 + $0x50] sm:$0xff] %v708_v26  ;;  %v1095_v27 = vpop.f32.mrb[6].mxu1 }
 0x242   :  { %v723_v28 = vadd.f32 %v1095_v27, %v1585_v4  ;;  %v717_v29 = vpop.f32.mrb[7].mxu1 }
 0x243   :  { %v718_v30 = vadd.f32 %v1585_v4, %v717_v29 }
 0x244   :  { %829 = vst [vmem:[#allocation13 + $0x68] sm:$0xff] %v723_v28 }
 0x245   :  { %828 = vst [vmem:[#allocation13 + $0x60] sm:$0xff] %v718_v30  ;;  %v1098_v31 = vpop.f32.mrb[8].mxu1 }
 0x246   :  { %v733_v32 = vadd.f32 %v1098_v31, %v1585_v4  ;;  %v727_v33 = vpop.f32.mrb[9].mxu1 }
 0x247   :  { %v728_v34 = vadd.f32 %v1585_v4, %v727_v33 }
 0x248   :  { %831 = vst [vmem:[#allocation13 + $0x78] sm:$0xff] %v733_v32 }
 0x249   :  { %830 = vst [vmem:[#allocation13 + $0x70] sm:$0xff] %v728_v34  ;;  %v1101_v35 = vpop.f32.mrb[10].mxu1 }
 0x24a   :  { %v743_v36 = vadd.f32 %v1101_v35, %v1585_v4  ;;  %v737_v37 = vpop.f32.mrb[11].mxu1 }
 0x24b   :  { %v738_v38 = vadd.f32 %v1585_v4, %v737_v37 }
 0x24c   :  { %833 = vst [vmem:[#allocation13 + $0x88] sm:$0xff] %v743_v36 }
 0x24d   :  { %832 = vst [vmem:[#allocation13 + $0x80] sm:$0xff] %v738_v38  ;;  %v1104_v39 = vpop.f32.mrb[12].mxu1 }
 0x24e   :  { %v753_v40 = vadd.f32 %v1104_v39, %v1585_v4  ;;  %v747_v41 = vpop.f32.mrb[13].mxu1 }
 0x24f   :  { %v748_v42 = vadd.f32 %v1585_v4, %v747_v41 }
 0x250   :  { %835 = vst [vmem:[#allocation13 + $0x98] sm:$0xff] %v753_v40 }
 0x251   :  { %834 = vst [vmem:[#allocation13 + $0x90] sm:$0xff] %v748_v42  ;;  %v1107_v43 = vpop.f32.mrb[14].mxu1 }
 0x252   :  { %v763_v44 = vadd.f32 %v1107_v43, %v1585_v4  ;;  %v757_v45 = vpop.f32.mrb[15].mxu1 }
 0x253   :  { %v758_v46 = vadd.f32 %v1585_v4, %v757_v45 }
 0x254   :  { %837 = vst [vmem:[#allocation13 + $0xa8] sm:$0xff] %v763_v44 }
 0x255   :  { %836 = vst [vmem:[#allocation13 + $0xa0] sm:$0xff] %v758_v46  ;;  %v1110_v47 = vpop.f32.mrb[16].mxu1 }
 0x256   :  { %v773_v48 = vadd.f32 %v1110_v47, %v1585_v4  ;;  %v767_v49 = vpop.f32.mrb[17].mxu1 }
 0x257   :  { %v768_v50 = vadd.f32 %v1585_v4, %v767_v49 }
 0x258   :  { %839 = vst [vmem:[#allocation13 + $0xb8] sm:$0xff] %v773_v48 }
 0x259   :  { %838 = vst [vmem:[#allocation13 + $0xb0] sm:$0xff] %v768_v50  ;;  %v1113_v51 = vpop.f32.mrb[18].mxu1 }
 0x25a   :  { %v783_v52 = vadd.f32 %v1113_v51, %v1585_v4  ;;  %v777_v53 = vpop.f32.mrb[19].mxu1 }
 0x25b   :  { %v778_v54 = vadd.f32 %v1585_v4, %v777_v53 }
 0x25c   :  { %841 = vst [vmem:[#allocation13 + $0xc8] sm:$0xff] %v783_v52 }
 0x25d   :  { %840 = vst [vmem:[#allocation13 + $0xc0] sm:$0xff] %v778_v54  ;;  %v1116_v55 = vpop.f32.mrb[20].mxu1 }
 0x25e   :  { %v793_v56 = vadd.f32 %v1116_v55, %v1585_v4  ;;  %v787_v57 = vpop.f32.mrb[21].mxu1 }
 0x25f   :  { %v788_v58 = vadd.f32 %v1585_v4, %v787_v57 }
 0x260   :  { %843 = vst [vmem:[#allocation13 + $0xd8] sm:$0xff] %v793_v56 }
 0x261   :  { %842 = vst [vmem:[#allocation13 + $0xd0] sm:$0xff] %v788_v58  ;;  %v1119_v59 = vpop.f32.mrb[22].mxu1 }
 0x262   :  { %v803_v60 = vadd.f32 %v1119_v59, %v1585_v4  ;;  %v797_v61 = vpop.f32.mrb[23].mxu1 }
 0x263   :  { %v798_v63 = vadd.f32 %v1585_v4, %v797_v61 }
 0x264   :  { %845 = vst [vmem:[#allocation13 + $0xe8] sm:$0xff] %v803_v60 }
 0x265   :  { %844 = vst [vmem:[#allocation13 + $0xe0] sm:$0xff] %v798_v63  ;;  %v1122_v1 = vpop.f32.mrb[24].mxu1 }
 0x266   :  { %v813_v2 = vadd.f32 %v1122_v1, %v1585_v4  ;;  %v807_v3 = vpop.f32.mrb[25].mxu1 }
 0x267   :  { %v808_v5 = vadd.f32 %v1585_v4, %v807_v3 }
 0x268   :  { %847 = vst [vmem:[#allocation13 + $0xf8] sm:$0xff] %v813_v2 }
 0x269   :  { %846 = vst [vmem:[#allocation13 + $0xf0] sm:$0xff] %v808_v5 }
 0x26a   :  { %1331 = shalt.err (!%p1328_p10)
}
 0x26b   :  { %s1332_s26 = scalar_lea.hbm %s1640_s6, 4096 }
 0x26c   :  { %p1333_p11 = scmp.ne.s32.totalorder %s1640_s6, %s1332_s26  ;;  %p1336_p12 = scmp.lt.u32.totalorder %s1332_s26, %s1640_s6 }
 0x26e   :  { %p1338_p13 = pnand %p1336_p12, %p1333_p11 }
 0x270   :  { %1341 = shalt.err (!%p1338_p13)
}
 0x271   :  { %859 = dma.vmem_to_hbm [thread:$0]  %s854_s0, 4096, %s1640_s6, [#allocation4], %s1354_s9, %s1354_s9, %s1355_s10  }
 0x272   :  { %1350 = dma.done.wait [#allocation4], 4096  }
 0x273   :  { %1351 = vsyncadd [#allocation4], 4294963200 }
 0x274   :  { %863 = vsyncpa [#allocation3], 1 }
 0x275   :  { %864 = vsyncpa [#allocation6], 1 }
 0x276   :  { %865 = vsyncpa [#allocation9], 1 }
 0x277   :  { %866 = vsyncpa [#allocation12], 1 }
 0x278   :  { %867 = vsyncpa [#allocation4], 1 }

</bundles_post_ra>
